<compile_context>
chip_gen: v7x
topology: tpu7x:2x2x1
jax: 0.10.0
libtpu: 0.0.40
codegen_flags: <defaults>
</compile_context>

<pallas_src>
from functools import partial

import jax
import jax.numpy as jnp
from jax.experimental import pallas as pl
from jax.experimental.pallas import tpu as pltpu

BN_EPS = 1e-5
VMEM_LIMIT_BYTES = 32 * 1024 * 1024  # >= default scoped limit on v5e/v6e/v7x


def _round_up(a, b):
    return (a + b - 1) // b * b


def _bn_stats_kernel(x_ref, w_ref, sum_ref, sq_ref):
    # x_ref:   (TILE_M, Cin)    bf16 tile of flattened strided pixels
    # w_ref:   (Cin, Cout_p)    bf16 conv weight (resident)
    # sum_ref: (1, Cout_p)      f32 running sum(y)   (resident accumulator)
    # sq_ref:  (1, Cout_p)      f32 running sum(y*y) (resident accumulator)
    i = pl.program_id(0)

    @pl.when(i == 0)
    def _():
        sum_ref[...] = jnp.zeros_like(sum_ref)
        sq_ref[...] = jnp.zeros_like(sq_ref)

    y = jnp.dot(x_ref[...], w_ref[...], preferred_element_type=jnp.float32)
    sum_ref[...] += jnp.sum(y, axis=0, keepdims=True)
    sq_ref[...] += jnp.sum(y * y, axis=0, keepdims=True)


def _bn_apply_kernel(x_ref, w_ref, scale_ref, shift_ref, o_ref):
    # x_ref:     (TILE_M, Cin)   bf16
    # w_ref:     (Cin, Cout_p)   bf16 (resident)
    # scale_ref: (1, Cout_p)     f32  gamma * rsqrt(var+eps)     (resident)
    # shift_ref: (1, Cout_p)     f32  beta - mean * scale        (resident)
    # o_ref:     (TILE_M, Cout_p)
    y = jnp.dot(x_ref[...], w_ref[...], preferred_element_type=jnp.float32)
    o_ref[...] = (y * scale_ref[...] + shift_ref[...]).astype(o_ref.dtype)


@partial(jax.jit, static_argnames=("stride", "eps", "tile_m"))
def basic_downsample(x, w, gamma, beta, stride, eps=BN_EPS, tile_m=1024):
    """x: (N, Cin, H, W) NCHW; w: (Cout, Cin) squeezed 1x1 conv kernel;
    gamma/beta: (Cout,).  Returns (N, Cout, Ho, Wo) NCHW."""
    N, Cin, H, W = x.shape
    Cout = w.shape[0]

    # --- glue: strided subsample + flatten to (M, Cin), bf16 for the MXU ---
    xs = x[:, :, ::stride, ::stride]
    Ho, Wo = xs.shape[2], xs.shape[3]
    M = N * Ho * Wo
    xm = jnp.transpose(xs, (0, 2, 3, 1)).reshape(M, Cin).astype(jnp.bfloat16)
    wt = jnp.transpose(w, (1, 0)).astype(jnp.bfloat16)  # (Cin, Cout)

    # lane-dense output channels (multiple of 128)
    LANE = 128
    Cout_p = _round_up(Cout, LANE)
    pad_c = Cout_p - Cout
    if pad_c:
        wt = jnp.pad(wt, ((0, 0), (0, pad_c)))
        gamma_p = jnp.pad(gamma, (0, pad_c))
        beta_p = jnp.pad(beta, (0, pad_c))
    else:
        gamma_p, beta_p = gamma, beta

    # tile M; zero-pad to a multiple of the tile (zeros are exact for the sums)
    tile_m = min(tile_m, _round_up(M, 8))
    M_p = _round_up(M, tile_m)
    if M_p != M:
        xm = jnp.pad(xm, ((0, M_p - M), (0, 0)))
    num_tiles = M_p // tile_m

    x_spec = pl.BlockSpec((tile_m, Cin), lambda i: (i, 0))
    w_spec = pl.BlockSpec((Cin, Cout_p), lambda i: (0, 0))
    vec_spec = pl.BlockSpec((1, Cout_p), lambda i: (0, 0))

    # ---------------- pass 1: global per-channel statistics ----------------
    ssum, ssq = pl.pallas_call(
        _bn_stats_kernel,
        out_shape=(
            jax.ShapeDtypeStruct((1, Cout_p), jnp.float32),
            jax.ShapeDtypeStruct((1, Cout_p), jnp.float32),
        ),
        grid=(num_tiles,),
        in_specs=[x_spec, w_spec],
        out_specs=(vec_spec, vec_spec),
        compiler_params=pltpu.CompilerParams(
            dimension_semantics=("arbitrary",),
            vmem_limit_bytes=VMEM_LIMIT_BYTES,
        ),
    )(xm, wt)

    # --------- tiny finalize in plain JAX: fold BN into scale/shift --------
    mean = ssum / jnp.float32(M)                       # (1, Cout_p)
    ex2 = ssq / jnp.float32(M)
    var = jnp.maximum(ex2 - mean * mean, 0.0)          # biased var (BN training)
    inv = jax.lax.rsqrt(var + jnp.float32(eps))
    scale = gamma_p.reshape(1, Cout_p).astype(jnp.float32) * inv
    shift = beta_p.reshape(1, Cout_p).astype(jnp.float32) - mean * scale

    # ---------------- pass 2: recompute y and normalize --------------------
    out_flat = pl.pallas_call(
        _bn_apply_kernel,
        out_shape=jax.ShapeDtypeStruct((M_p, Cout_p), jnp.float32),
        grid=(num_tiles,),
        in_specs=[x_spec, w_spec, vec_spec, vec_spec],
        out_specs=pl.BlockSpec((tile_m, Cout_p), lambda i: (i, 0)),
        compiler_params=pltpu.CompilerParams(
            dimension_semantics=("parallel",),
            vmem_limit_bytes=VMEM_LIMIT_BYTES,
        ),
    )(xm, wt, scale, shift)

    out_flat = out_flat[:M, :Cout].astype(x.dtype)
    return jnp.transpose(out_flat.reshape(N, Ho, Wo, Cout), (0, 3, 1, 2))


if __name__ == "__main__":
    key = jax.random.PRNGKey(0)
    k_x, k_w, k_g, k_b = jax.random.split(key, 4)

    # small shapes consistent with the module: batch=2, in_ch=4, out_ch=8,
    # spatial=16, stride=2
    N, Cin, Cout, H, W, stride = 2, 4, 8, 16, 16, 2

    x = jax.random.normal(k_x, (N, Cin, H, W), dtype=jnp.float32)
    # conv weight (Cout, Cin, 1, 1) -> stored squeezed as (Cout, Cin)
    w = jax.random.normal(k_w, (Cout, Cin), dtype=jnp.float32) * 0.1
    gamma = 1.0 + 0.1 * jax.random.normal(k_g, (Cout,), dtype=jnp.float32)
    beta = 0.1 * jax.random.normal(k_b, (Cout,), dtype=jnp.float32)

    out = basic_downsample(x, w, gamma, beta, stride=stride)
    out = jax.block_until_ready(out)
    assert out.shape == (N, Cout, H // stride, W // stride), out.shape

    # pure-JAX f32 reference (bf16 MXU inputs -> loose tolerance)
    xs = x[:, :, ::stride, ::stride]
    y_ref = jnp.einsum("nchw,oc->nohw", xs, w)
    mu = jnp.mean(y_ref, axis=(0, 2, 3), keepdims=True)
    var = jnp.mean((y_ref - mu) ** 2, axis=(0, 2, 3), keepdims=True)
    ref = (y_ref - mu) * jax.lax.rsqrt(var + BN_EPS)
    ref = ref * gamma.reshape(1, -1, 1, 1) + beta.reshape(1, -1, 1, 1)
    max_err = float(jnp.max(jnp.abs(out - ref)))
    assert jnp.allclose(out, ref, atol=5e-2, rtol=5e-2), max_err

    print("KERNEL_OK")
</pallas_src>

<mosaic_0001>
module attributes {stable_mosaic.version = 11 : i64} {
  func.func @_bn_apply_kernel(%arg0: i32, %arg1: memref<128x4xbf16, #tpu.memory_space<vmem>>, %arg2: memref<4x128xbf16, #tpu.memory_space<vmem>>, %arg3: memref<1x128xf32, #tpu.memory_space<vmem>>, %arg4: memref<1x128xf32, #tpu.memory_space<vmem>>, %arg5: memref<128x128xf32, #tpu.memory_space<vmem>>) attributes {dimension_semantics = [#tpu.dimension_semantics<parallel>], iteration_bounds = array<i64: 1>, scalar_prefetch = 0 : i64, scratch_operands = 0 : i64, tpu.core_type = #tpu.core_type<tc>, window_params = [{transform_indices = @transform_0, window_bounds = array<i64: 128, 4>}, {pipeline_mode = #tpu.pipeline_mode<synchronous>, transform_indices = @transform_1, window_bounds = array<i64: 4, 128>}, {pipeline_mode = #tpu.pipeline_mode<synchronous>, transform_indices = @transform_2, window_bounds = array<i64: 1, 128>}, {pipeline_mode = #tpu.pipeline_mode<synchronous>, transform_indices = @transform_3, window_bounds = array<i64: 1, 128>}, {transform_indices = @transform_4, window_bounds = array<i64: 128, 128>}]} {
    %c0 = arith.constant 0 : index
    %c0_0 = arith.constant 0 : index
    %0 = vector.load %arg1[%c0, %c0_0] : memref<128x4xbf16, #tpu.memory_space<vmem>>, vector<128x4xbf16>
    %c0_1 = arith.constant 0 : index
    %c0_2 = arith.constant 0 : index
    %1 = vector.load %arg2[%c0_1, %c0_2] : memref<4x128xbf16, #tpu.memory_space<vmem>>, vector<4x128xbf16>
    %cst = arith.constant dense<0.000000e+00> : vector<128x128xf32>
    %2 = tpu.matmul %0, %1, %cst {dimension_numbers = #tpu.dot_dimension_numbers<[1], [0], [0], [1], [0, 0, 1, 1], [], []>} : vector<128x4xbf16>, vector<4x128xbf16>, vector<128x128xf32> -> vector<128x128xf32>
    %c0_3 = arith.constant 0 : index
    %c0_4 = arith.constant 0 : index
    %3 = vector.load %arg3[%c0_3, %c0_4] : memref<1x128xf32, #tpu.memory_space<vmem>>, vector<1x128xf32>
    %4 = vector.broadcast %3 : vector<1x128xf32> to vector<128x128xf32>
    %5 = arith.mulf %2, %4 : vector<128x128xf32>
    %c0_5 = arith.constant 0 : index
    %c0_6 = arith.constant 0 : index
    %6 = vector.load %arg4[%c0_5, %c0_6] : memref<1x128xf32, #tpu.memory_space<vmem>>, vector<1x128xf32>
    %7 = vector.broadcast %6 : vector<1x128xf32> to vector<128x128xf32>
    %8 = arith.addf %5, %7 : vector<128x128xf32>
    %c0_7 = arith.constant 0 : index
    %c0_8 = arith.constant 0 : index
    %9 = vector.load %arg5[%c0_7, %c0_8] : memref<128x128xf32, #tpu.memory_space<vmem>>, vector<128x128xf32>
    tpu.vector_store %arg5[%c0_7, %c0_8], %8 {strides = array<i32>} : memref<128x128xf32, #tpu.memory_space<vmem>>, vector<128x128xf32>,
    return
  }
  func.func @transform_0(%arg0: i32) -> (i32, i32) {
    %c0_i32 = arith.constant 0 : i32
    %c0_i32_0 = arith.constant 0 : i32
    return %arg0, %c0_i32 : i32, i32
  }
  func.func @transform_1(%arg0: i32) -> (i32, i32) {
    %c0_i32 = arith.constant 0 : i32
    %c0_i32_0 = arith.constant 0 : i32
    %c0_i32_1 = arith.constant 0 : i32
    return %c0_i32, %c0_i32_0 : i32, i32
  }
  func.func @transform_2(%arg0: i32) -> (i32, i32) {
    %c0_i32 = arith.constant 0 : i32
    %c0_i32_0 = arith.constant 0 : i32
    %c0_i32_1 = arith.constant 0 : i32
    return %c0_i32, %c0_i32_0 : i32, i32
  }
  func.func @transform_3(%arg0: i32) -> (i32, i32) {
    %c0_i32 = arith.constant 0 : i32
    %c0_i32_0 = arith.constant 0 : i32
    %c0_i32_1 = arith.constant 0 : i32
    return %c0_i32, %c0_i32_0 : i32, i32
  }
  func.func @transform_4(%arg0: i32) -> (i32, i32) {
    %c0_i32 = arith.constant 0 : i32
    %c0_i32_0 = arith.constant 0 : i32
    return %arg0, %c0_i32 : i32, i32
  }
}

module attributes {stable_mosaic.version = 11 : i64} {
  func.func @_bn_stats_kernel(%arg0: i32, %arg1: memref<128x4xbf16, #tpu.memory_space<vmem>>, %arg2: memref<4x128xbf16, #tpu.memory_space<vmem>>, %arg3: memref<1x128xf32, #tpu.memory_space<vmem>>, %arg4: memref<1x128xf32, #tpu.memory_space<vmem>>) attributes {dimension_semantics = [#tpu.dimension_semantics<arbitrary>], iteration_bounds = array<i64: 1>, scalar_prefetch = 0 : i64, scratch_operands = 0 : i64, tpu.core_type = #tpu.core_type<tc>, window_params = [{transform_indices = @transform_0, window_bounds = array<i64: 128, 4>}, {pipeline_mode = #tpu.pipeline_mode<synchronous>, transform_indices = @transform_1, window_bounds = array<i64: 4, 128>}, {pipeline_mode = #tpu.pipeline_mode<synchronous>, transform_indices = @transform_2, window_bounds = array<i64: 1, 128>}, {pipeline_mode = #tpu.pipeline_mode<synchronous>, transform_indices = @transform_3, window_bounds = array<i64: 1, 128>}]} {
    %c0_i32 = arith.constant 0 : i32
    %0 = arith.cmpi eq, %arg0, %c0_i32 : i32
    %1 = arith.extui %0 : i1 to i32
    %c0_i32_0 = arith.constant 0 : i32
    %2 = arith.cmpi ne, %1, %c0_i32_0 : i32
    scf.if %2 {
      %cst_14 = arith.constant 0.000000e+00 : f32
      %17 = vector.broadcast %cst_14 : f32 to vector<1x128xf32>
      %c0_15 = arith.constant 0 : index
      %c0_16 = arith.constant 0 : index
      %18 = vector.load %arg3[%c0_15, %c0_16] : memref<1x128xf32, #tpu.memory_space<vmem>>, vector<1x128xf32>
      tpu.vector_store %arg3[%c0_15, %c0_16], %17 {strides = array<i32>} : memref<1x128xf32, #tpu.memory_space<vmem>>, vector<1x128xf32>,
      %cst_17 = arith.constant 0.000000e+00 : f32
      %19 = vector.broadcast %cst_17 : f32 to vector<1x128xf32>
      %c0_18 = arith.constant 0 : index
      %c0_19 = arith.constant 0 : index
      %20 = vector.load %arg4[%c0_18, %c0_19] : memref<1x128xf32, #tpu.memory_space<vmem>>, vector<1x128xf32>
      tpu.vector_store %arg4[%c0_18, %c0_19], %19 {strides = array<i32>} : memref<1x128xf32, #tpu.memory_space<vmem>>, vector<1x128xf32>,
    } else {
    }
    %c0 = arith.constant 0 : index
    %c0_1 = arith.constant 0 : index
    %3 = vector.load %arg1[%c0, %c0_1] : memref<128x4xbf16, #tpu.memory_space<vmem>>, vector<128x4xbf16>
    %c0_2 = arith.constant 0 : index
    %c0_3 = arith.constant 0 : index
    %4 = vector.load %arg2[%c0_2, %c0_3] : memref<4x128xbf16, #tpu.memory_space<vmem>>, vector<4x128xbf16>
    %cst = arith.constant dense<0.000000e+00> : vector<128x128xf32>
    %5 = tpu.matmul %3, %4, %cst {dimension_numbers = #tpu.dot_dimension_numbers<[1], [0], [0], [1], [0, 0, 1, 1], [], []>} : vector<128x4xbf16>, vector<4x128xbf16>, vector<128x128xf32> -> vector<128x128xf32>
    %c0_4 = arith.constant 0 : index
    %c0_5 = arith.constant 0 : index
    %6 = vector.load %arg3[%c0_4, %c0_5] : memref<1x128xf32, #tpu.memory_space<vmem>>, vector<1x128xf32>
    %cst_6 = arith.constant dense<0.000000e+00> : vector<128xf32>
    %7 = vector.multi_reduction <add>, %5, %cst_6 [0] : vector<128x128xf32> to vector<128xf32>
    %8 = vector.shape_cast %7 : vector<128xf32> to vector<1x128xf32>
    %9 = arith.addf %6, %8 : vector<1x128xf32>
    %c0_7 = arith.constant 0 : index
    %c0_8 = arith.constant 0 : index
    %10 = vector.load %arg3[%c0_7, %c0_8] : memref<1x128xf32, #tpu.memory_space<vmem>>, vector<1x128xf32>
    tpu.vector_store %arg3[%c0_7, %c0_8], %9 {strides = array<i32>} : memref<1x128xf32, #tpu.memory_space<vmem>>, vector<1x128xf32>,
    %c0_9 = arith.constant 0 : index
    %c0_10 = arith.constant 0 : index
    %11 = vector.load %arg4[%c0_9, %c0_10] : memref<1x128xf32, #tpu.memory_space<vmem>>, vector<1x128xf32>
    %12 = arith.mulf %5, %5 : vector<128x128xf32>
    %cst_11 = arith.constant dense<0.000000e+00> : vector<128xf32>
    %13 = vector.multi_reduction <add>, %12, %cst_11 [0] : vector<128x128xf32> to vector<128xf32>
    %14 = vector.shape_cast %13 : vector<128xf32> to vector<1x128xf32>
    %15 = arith.addf %11, %14 : vector<1x128xf32>
    %c0_12 = arith.constant 0 : index
    %c0_13 = arith.constant 0 : index
    %16 = vector.load %arg4[%c0_12, %c0_13] : memref<1x128xf32, #tpu.memory_space<vmem>>, vector<1x128xf32>
    tpu.vector_store %arg4[%c0_12, %c0_13], %15 {strides = array<i32>} : memref<1x128xf32, #tpu.memory_space<vmem>>, vector<1x128xf32>,
    return
  }
  func.func @transform_0(%arg0: i32) -> (i32, i32) {
    %c0_i32 = arith.constant 0 : i32
    %c0_i32_0 = arith.constant 0 : i32
    return %arg0, %c0_i32 : i32, i32
  }
  func.func @transform_1(%arg0: i32) -> (i32, i32) {
    %c0_i32 = arith.constant 0 : i32
    %c0_i32_0 = arith.constant 0 : i32
    %c0_i32_1 = arith.constant 0 : i32
    return %c0_i32, %c0_i32_0 : i32, i32
  }
  func.func @transform_2(%arg0: i32) -> (i32, i32) {
    %c0_i32 = arith.constant 0 : i32
    %c0_i32_0 = arith.constant 0 : i32
    %c0_i32_1 = arith.constant 0 : i32
    return %c0_i32, %c0_i32_0 : i32, i32
  }
  func.func @transform_3(%arg0: i32) -> (i32, i32) {
    %c0_i32 = arith.constant 0 : i32
    %c0_i32_0 = arith.constant 0 : i32
    %c0_i32_1 = arith.constant 0 : i32
    return %c0_i32, %c0_i32_0 : i32, i32
  }
}

</mosaic_0001>

<bundles_post_ra>
// kernel: basic_downsample.3
= control target key start
LH: loop header
LB: loop body
LE: loop exit
PB: predicated region body
PF: predicated region fallthrough
CT: control target
= control target key end

     0   :  { %vm100_vm0 = vcmask 1041408   ;;  %vm75_vm1 = vcmask 31744   ;;  %s438_s1 = inlined_call_operand.vmem [shape: bf16[4,128], index: 1, kind: input, shape index: {}]   ;;  %s439_s0 = inlined_call_operand.vmem [shape: bf16[128,4], index: 0, kind: input, shape index: {}]   ;;  %s440_s2 = inlined_call_operand.vmem [shape: f32[1,128], index: 2, kind: input, shape index: {}]   ;;  %s441_s3 = inlined_call_operand.vmem [shape: f32[1,128], index: 3, kind: input, shape index: {}]   ;;  %s442_s4 = inlined_call_operand.vmem [shape: f32[128,128], index: 4, kind: output, shape index: {}]  }
   0x1   :  { %v34_v0 = vld [vmem:[%s438_s1] sm:$0x3]  ;;  %v318_v4 = vld [vmem:[%s439_s0 + $0x8] sm:$0xff]   ;;  %v320_v6 = vld [vmem:[%s439_s0 + $0x10] sm:$0xff]  }
   0x2   :  { %314 = vmatprep.subr.msk.bf16.mxu0 %vm100_vm0, %v34_v0  ;;  %315 = vmatprep.subr.msk.bf16.mxu1 %vm100_vm0, %v34_v0  ;;  %v102_v1 = vsel %vm100_vm0, %v34_v0, 0  ;;  %v316_v2 = vld [vmem:[%s439_s0] sm:$0xff]   ;;  %v319_v5 = vld [vmem:[%s439_s0 + $0x28] sm:$0xff]   ;;  %v321_v7 = vld [vmem:[%s439_s0 + $0x30] sm:$0xff]  }
   0x3   :  { %295 = vmatpush3.bf16.msra.mxu0 %v102_v1  ;;  %313 = vmatpush3.bf16.msra.mxu1 %v102_v1  ;;  %v317_v3 = vld [vmem:[%s439_s0 + $0x20] sm:$0xff]   ;;  %v322_v8 = vld [vmem:[%s439_s0 + $0x18] sm:$0xff]  }
   0x4   :  { %296 = vmatprep.mubr.msk.bf16.mxu0 %vm75_vm1, %v316_v2  ;;  %304 = vmatprep.mubr.msk.bf16.mxu1 %vm75_vm1, %v317_v3  ;;  %v323_v9 = vld [vmem:[%s439_s0 + $0x38] sm:$0xff]   ;;  %v283_v10 = vld [vmem:[%s440_s2] ss:$0 sm:$0xff] }
   0x5   :  { %v284_v12 = vld [vmem:[%s441_s3] ss:$0 sm:$0xff] }
   0x6   :  { %297 = vmatmul.mubr.msk.bf16.vlgmr.msra.gmra.mrb[0].mxu0 %vm75_vm1, %v318_v4  ;;  %305 = vmatmul.mubr.msk.bf16.vlgmr.msra.gmra.mrb[0].mxu1 %vm75_vm1, %v319_v5 }
   0x7   :  { %300 = vmatprep.mubr.msk.bf16.mxu0 %vm75_vm1, %v320_v6  ;;  %308 = vmatprep.mubr.msk.bf16.mxu1 %vm75_vm1, %v321_v7 }
   0xe   :  { %301 = vmatmul.mubr.msk.bf16.gmra.mrb[4].mxu0 %vm75_vm1, %v322_v8  ;;  %309 = vmatmul.mubr.msk.bf16.gmra.mrb[4].mxu1 %vm75_vm1, %v323_v9 }
  0xd9   :  { %v298_v11 = vpop.f32.mrb[0].mxu0  ;;  %v306_v14 = vpop.f32.mrb[0].mxu1 }
  0xda   :  { %v210_v13 = vmul.f32 %v298_v11, %v283_v10  ;;  %v138_v15 = vpop.f32.mrb[1].mxu0  ;;  %v218_v16 = vmul.f32 %v306_v14, %v283_v10  ;;  %v170_v18 = vpop.f32.mrb[1].mxu1 }
  0xdb   :  { %v208_v17 = vmul.f32 %v283_v10, %v138_v15  ;;  %v299_v19 = vpop.f32.mrb[2].mxu0  ;;  %v216_v21 = vmul.f32 %v283_v10, %v170_v18  ;;  %v307_v23 = vpop.f32.mrb[2].mxu1 }
  0xdc   :  { %v233_v20 = vadd.f32 %v284_v12, %v210_v13  ;;  %v211_v22 = vmul.f32 %v299_v19, %v283_v10  ;;  %v141_v24 = vpop.f32.mrb[3].mxu0  ;;  %v241_v25 = vadd.f32 %v284_v12, %v218_v16  ;;  %v219_v27 = vmul.f32 %v307_v23, %v283_v10  ;;  %v173_v29 = vpop.f32.mrb[3].mxu1 }
  0xdd   :  { %v231_v26 = vadd.f32 %v284_v12, %v208_v17  ;;  %v209_v28 = vmul.f32 %v283_v10, %v141_v24  ;;  %v239_v30 = vadd.f32 %v284_v12, %v216_v21  ;;  %v217_v32 = vmul.f32 %v283_v10, %v173_v29 }
  0xde   :  { %249 = vst [vmem:[%s442_s4 + $0x10] sm:$0xff] %v233_v20  ;;  %v234_v31 = vadd.f32 %v284_v12, %v211_v22  ;;  %257 = vst [vmem:[%s442_s4 + $0x50] sm:$0xff] %v241_v25  ;;  %v242_v33 = vadd.f32 %v284_v12, %v219_v27 }
  0xdf   :  { %247 = vst [vmem:[%s442_s4] sm:$0xff] %v231_v26  ;;  %v232_v34 = vadd.f32 %v284_v12, %v209_v28  ;;  %255 = vst [vmem:[%s442_s4 + $0x40] sm:$0xff] %v239_v30  ;;  %v240_v35 = vadd.f32 %v284_v12, %v217_v32 }
  0xe0   :  { %250 = vst [vmem:[%s442_s4 + $0x18] sm:$0xff] %v234_v31  ;;  %258 = vst [vmem:[%s442_s4 + $0x58] sm:$0xff] %v242_v33 }
  0xe1   :  { %248 = vst [vmem:[%s442_s4 + $0x8] sm:$0xff] %v232_v34  ;;  %v302_v36 = vpop.f32.mrb[4].mxu0  ;;  %256 = vst [vmem:[%s442_s4 + $0x48] sm:$0xff] %v240_v35  ;;  %v310_v38 = vpop.f32.mrb[4].mxu1 }
  0xe2   :  { %v214_v37 = vmul.f32 %v302_v36, %v283_v10  ;;  %v154_v39 = vpop.f32.mrb[5].mxu0  ;;  %v222_v40 = vmul.f32 %v310_v38, %v283_v10  ;;  %v186_v42 = vpop.f32.mrb[5].mxu1 }
  0xe3   :  { %v212_v41 = vmul.f32 %v283_v10, %v154_v39  ;;  %v303_v43 = vpop.f32.mrb[6].mxu0  ;;  %v220_v45 = vmul.f32 %v283_v10, %v186_v42  ;;  %v311_v47 = vpop.f32.mrb[6].mxu1 }
  0xe4   :  { %v237_v44 = vadd.f32 %v284_v12, %v214_v37  ;;  %v215_v46 = vmul.f32 %v303_v43, %v283_v10  ;;  %v157_v48 = vpop.f32.mrb[7].mxu0  ;;  %v245_v49 = vadd.f32 %v284_v12, %v222_v40  ;;  %v223_v51 = vmul.f32 %v311_v47, %v283_v10  ;;  %v189_v53 = vpop.f32.mrb[7].mxu1 }
  0xe5   :  { %v235_v50 = vadd.f32 %v284_v12, %v212_v41  ;;  %v213_v52 = vmul.f32 %v283_v10, %v157_v48  ;;  %v243_v54 = vadd.f32 %v284_v12, %v220_v45  ;;  %v221_v56 = vmul.f32 %v283_v10, %v189_v53 }
  0xe6   :  { %253 = vst [vmem:[%s442_s4 + $0x30] sm:$0xff] %v237_v44  ;;  %v238_v55 = vadd.f32 %v284_v12, %v215_v46  ;;  %261 = vst [vmem:[%s442_s4 + $0x70] sm:$0xff] %v245_v49  ;;  %v246_v57 = vadd.f32 %v284_v12, %v223_v51 }
  0xe7   :  { %251 = vst [vmem:[%s442_s4 + $0x20] sm:$0xff] %v235_v50  ;;  %v236_v58 = vadd.f32 %v284_v12, %v213_v52  ;;  %259 = vst [vmem:[%s442_s4 + $0x60] sm:$0xff] %v243_v54  ;;  %v244_v59 = vadd.f32 %v284_v12, %v221_v56 }
  0xe8   :  { %254 = vst [vmem:[%s442_s4 + $0x38] sm:$0xff] %v238_v55  ;;  %262 = vst [vmem:[%s442_s4 + $0x78] sm:$0xff] %v246_v57 }
  0xe9   :  { %252 = vst [vmem:[%s442_s4 + $0x28] sm:$0xff] %v236_v58  ;;  %260 = vst [vmem:[%s442_s4 + $0x68] sm:$0xff] %v244_v59 }

// kernel: basic_downsample.2
= control target key start
LH: loop header
LB: loop body
LE: loop exit
PB: predicated region body
PF: predicated region fallthrough
CT: control target
= control target key end

     0   :  { %vm102_vm0 = vcmask 1041408   ;;  %vm77_vm1 = vcmask 31744   ;;  %v331_v10 = vmov 0.0   ;;  %s405_s1 = inlined_call_operand.vmem [shape: bf16[4,128], index: 1, kind: input, shape index: {}]   ;;  %s406_s0 = inlined_call_operand.vmem [shape: bf16[128,4], index: 0, kind: input, shape index: {}]   ;;  %s407_s2 = inlined_call_operand.vmem [shape: f32[1,128], index: 2, kind: output, shape index: {0}]   ;;  %s408_s3 = inlined_call_operand.vmem [shape: f32[1,128], index: 3, kind: output, shape index: {1}]  }
   0x1   :  { %v36_v0 = vld [vmem:[%s405_s1] sm:$0x3]  ;;  %v324_v3 = vld [vmem:[%s406_s0 + $0x8] sm:$0xff]   ;;  %v325_v4 = vld [vmem:[%s406_s0 + $0x10] sm:$0xff]   ;;  %18 = vst [vmem:[%s407_s2] sm:$0x1] %v331_v10 }
   0x2   :  { %320 = vmatprep.subr.msk.bf16.mxu0 %vm102_vm0, %v36_v0  ;;  %v104_v1 = vsel %vm102_vm0, %v36_v0, 0  ;;  %v323_v2 = vld [vmem:[%s406_s0] sm:$0xff]   ;;  %321 = vmatprep.subr.msk.bf16.mxu1 %vm102_vm0, %v36_v0  ;;  %v328_v6 = vld [vmem:[%s406_s0 + $0x28] sm:$0xff]   ;;  %v329_v7 = vld [vmem:[%s406_s0 + $0x30] sm:$0xff]   ;;  %19 = vst [vmem:[%s408_s3] sm:$0x1] %v331_v10 }
   0x3   :  { %301 = vmatpush3.bf16.msra.mxu0 %v104_v1  ;;  %319 = vmatpush3.bf16.msra.mxu1 %v104_v1  ;;  %v327_v5 = vld [vmem:[%s406_s0 + $0x20] sm:$0xff]   ;;  %v326_v8 = vld [vmem:[%s406_s0 + $0x18] sm:$0xff]  }
   0x4   :  { %302 = vmatprep.mubr.msk.bf16.mxu0 %vm77_vm1, %v323_v2  ;;  %310 = vmatprep.mubr.msk.bf16.mxu1 %vm77_vm1, %v327_v5  ;;  %v330_v9 = vld [vmem:[%s406_s0 + $0x38] sm:$0xff]  }
   0x6   :  { %303 = vmatmul.mubr.msk.bf16.vlgmr.msra.gmra.mrb[0].mxu0 %vm77_vm1, %v324_v3  ;;  %311 = vmatmul.mubr.msk.bf16.vlgmr.msra.gmra.mrb[0].mxu1 %vm77_vm1, %v328_v6 }
   0x7   :  { %306 = vmatprep.mubr.msk.bf16.mxu0 %vm77_vm1, %v325_v4  ;;  %314 = vmatprep.mubr.msk.bf16.mxu1 %vm77_vm1, %v329_v7 }
   0xe   :  { %307 = vmatmul.mubr.msk.bf16.gmra.mrb[4].mxu0 %vm77_vm1, %v326_v8  ;;  %315 = vmatmul.mubr.msk.bf16.gmra.mrb[4].mxu1 %vm77_vm1, %v330_v9 }
  0xd9   :  { %v304_v11 = vpop.f32.mrb[0].mxu0  ;;  %v312_v15 = vpop.f32.mrb[0].mxu1 }
  0xda   :  { %v140_v12 = vpop.f32.mrb[1].mxu0  ;;  %v172_v19 = vpop.f32.mrb[1].mxu1  ;;  %v230_v21 = vmul.f32 %v304_v11, %v304_v11  ;;  %v238_v54 = vmul.f32 %v312_v15, %v312_v15 }
  0xdb   :  { %v305_v13 = vpop.f32.mrb[2].mxu0  ;;  %v228_v16 = vmul.f32 %v140_v12, %v140_v12  ;;  %v313_v20 = vpop.f32.mrb[2].mxu1  ;;  %v236_v48 = vmul.f32 %v172_v19, %v172_v19 }
  0xdc   :  { %v143_v14 = vpop.f32.mrb[3].mxu0  ;;  %v175_v24 = vpop.f32.mrb[3].mxu1  ;;  %v231_v25 = vmul.f32 %v305_v13, %v305_v13  ;;  %v239_v57 = vmul.f32 %v313_v20, %v313_v20 }
  0xdd   :  { %v204_v17 = vadd.f32 %v143_v14, %v140_v12  ;;  %v229_v18 = vmul.f32 %v143_v14, %v143_v14  ;;  %v237_v53 = vmul.f32 %v175_v24, %v175_v24 }
  0xdf   :  { %v205_v22 = vadd.f32 %v304_v11, %v204_v17  ;;  %v244_v23 = vadd.f32 %v229_v18, %v228_v16  ;;  %v203_v18 = vld [vmem:[%s407_s2] sm:$0x1] }
  0xe1   :  { %v245_v26 = vadd.f32 %v244_v23, %v230_v21  ;;  %v308_v27 = vpop.f32.mrb[4].mxu0  ;;  %v206_v28 = vadd.f32 %v305_v13, %v205_v22  ;;  %v316_v35 = vpop.f32.mrb[4].mxu1  ;;  %v227_v21 = vld [vmem:[%s408_s3] sm:$0x1] }
  0xe2   :  { %v156_v29 = vpop.f32.mrb[5].mxu0  ;;  %v188_v39 = vpop.f32.mrb[5].mxu1  ;;  %v234_v41 = vmul.f32 %v308_v27, %v308_v27  ;;  %v242_v2 = vmul.f32 %v316_v35, %v316_v35 }
  0xe3   :  { %v207_v30 = vadd.f32 %v206_v28, %v156_v29  ;;  %v232_v31 = vmul.f32 %v156_v29, %v156_v29  ;;  %v246_v32 = vadd.f32 %v245_v26, %v231_v25  ;;  %v309_v33 = vpop.f32.mrb[6].mxu0  ;;  %v317_v40 = vpop.f32.mrb[6].mxu1  ;;  %v240_v60 = vmul.f32 %v188_v39, %v188_v39 }
  0xe4   :  { %v159_v34 = vpop.f32.mrb[7].mxu0  ;;  %v191_v44 = vpop.f32.mrb[7].mxu1  ;;  %v235_v45 = vmul.f32 %v309_v33, %v309_v33  ;;  %v243_v5 = vmul.f32 %v317_v40, %v317_v40 }
  0xe5   :  { %v247_v36 = vadd.f32 %v246_v32, %v232_v31  ;;  %v208_v37 = vadd.f32 %v207_v30, %v159_v34  ;;  %v233_v38 = vmul.f32 %v159_v34, %v159_v34  ;;  %v241_v1 = vmul.f32 %v191_v44, %v191_v44 }
  0xe7   :  { %v209_v42 = vadd.f32 %v308_v27, %v208_v37  ;;  %v248_v43 = vadd.f32 %v247_v36, %v233_v38 }
  0xe9   :  { %v249_v46 = vadd.f32 %v248_v43, %v234_v41  ;;  %v210_v47 = vadd.f32 %v309_v33, %v209_v42 }
  0xeb   :  { %v211_v49 = vadd.f32 %v210_v47, %v172_v19  ;;  %v250_v50 = vadd.f32 %v249_v46, %v235_v45 }
  0xed   :  { %v251_v51 = vadd.f32 %v250_v50, %v236_v48  ;;  %v212_v52 = vadd.f32 %v211_v49, %v175_v24 }
  0xef   :  { %v213_v55 = vadd.f32 %v312_v15, %v212_v52  ;;  %v252_v56 = vadd.f32 %v251_v51, %v237_v53 }
  0xf1   :  { %v253_v58 = vadd.f32 %v252_v56, %v238_v54  ;;  %v214_v59 = vadd.f32 %v313_v20, %v213_v55 }
  0xf3   :  { %v215_v61 = vadd.f32 %v214_v59, %v188_v39  ;;  %v254_v62 = vadd.f32 %v253_v58, %v239_v57 }
  0xf5   :  { %v255_v63 = vadd.f32 %v254_v62, %v240_v60  ;;  %v216_v0 = vadd.f32 %v215_v61, %v191_v44 }
  0xf7   :  { %v217_v3 = vadd.f32 %v316_v35, %v216_v0  ;;  %v256_v4 = vadd.f32 %v255_v63, %v241_v1 }
  0xf9   :  { %v218_v6 = vadd.f32 %v317_v40, %v217_v3  ;;  %v257_v7 = vadd.f32 %v256_v4, %v242_v2 }
  0xfb   :  { %v219_v8 = vrot.slane %v218_v6, 4  ;;  %v258_v9 = vadd.f32 %v257_v7, %v243_v5 }
  0xfd   :  { %v220_v10 = vadd.f32 %v219_v8, %v218_v6  ;;  %v259_v11 = vrot.slane %v258_v9, 4 }
  0xff   :  { %v221_v12 = vrot.slane %v220_v10, 2  ;;  %v260_v13 = vadd.f32 %v259_v11, %v258_v9 }
 0x101   :  { %v222_v14 = vadd.f32 %v221_v12, %v220_v10  ;;  %v261_v15 = vrot.slane %v260_v13, 2 }
 0x103   :  { %v223_v16 = vrot.slane %v222_v14, 1  ;;  %v262_v17 = vadd.f32 %v261_v15, %v260_v13 }
 0x105   :  { %v224_v19 = vadd.f32 %v223_v16, %v222_v14  ;;  %v263_v20 = vrot.slane %v262_v17, 1 }
 0x107   :  { %v225_v22 = vadd.f32 %v224_v19, %v203_v18  ;;  %v264_v23 = vadd.f32 %v263_v20, %v262_v17 }
 0x109   :  { %226 = vst [vmem:[%s407_s2] sm:$0x1] %v225_v22  ;;  %v265_v24 = vadd.f32 %v264_v23, %v227_v21 }
 0x10b   :  { %266 = vst [vmem:[%s408_s3] sm:$0x1] %v265_v24 }

</bundles_post_ra>
